<compile_context>
chip_gen: v5e
topology: v5e:2x2
jax: 0.10.0
libtpu: 0.0.40
codegen_flags: <defaults>
</compile_context>

<pallas_src>
import math
from functools import partial

import jax
import jax.numpy as jnp
from jax.experimental import pallas as pl
from jax.experimental.pallas import tpu as pltpu

# -----------------------------------------------------------------------------
# Tiling helpers (v7x-safe tiles: fit comfortably in 32 MiB scoped VMEM with
# double buffering; all tile targets are multiples of 128).
# -----------------------------------------------------------------------------

_TM, _TN, _TK = 256, 512, 256   # generic matmul tiles
_TF = 512                       # FFN d_ff chunk
_TLN = 512                      # add+LN row tile


def _round_up(x, m):
    return ((x + m - 1) // m) * m


def _pick_tile(dim, target):
    """Return (tile, padded_dim). Small dims -> full-extent block (no padding)."""
    if dim <= target:
        return dim, dim
    return target, _round_up(dim, target)


# -----------------------------------------------------------------------------
# Kernel 1: tiled matmul + bias (+ optional ReLU), bf16 inputs, f32 accumulate
# -----------------------------------------------------------------------------

def _matmul_bias_kernel(x_ref, w_ref, b_ref, o_ref, acc_ref, *, activation):
    @pl.when(pl.program_id(2) == 0)
    def _():
        acc_ref[...] = jnp.zeros_like(acc_ref)

    acc_ref[...] += jnp.dot(x_ref[...], w_ref[...],
                            preferred_element_type=jnp.float32)

    @pl.when(pl.program_id(2) == pl.num_programs(2) - 1)
    def _():
        out = acc_ref[...] + b_ref[...]          # epilogue in f32 (v5e-safe)
        if activation == "relu":
            out = jnp.maximum(out, 0.0)
        o_ref[...] = out.astype(o_ref.dtype)


def matmul_bias(x, w, b, activation=None):
    """x: (M, K) f32, w: (K, N) f32, b: (N,) f32 -> (M, N) f32."""
    M, K = x.shape
    _, N = w.shape
    tm, Mp = _pick_tile(M, _TM)
    tk, Kp = _pick_tile(K, _TK)
    tn, Np = _pick_tile(N, _TN)

    xb = x.astype(jnp.bfloat16)
    wb = w.astype(jnp.bfloat16)
    if (Mp, Kp) != (M, K):
        xb = jnp.pad(xb, ((0, Mp - M), (0, Kp - K)))
    if (Kp, Np) != (K, N):
        wb = jnp.pad(wb, ((0, Kp - K), (0, Np - N)))
    b2 = b.reshape(1, N).astype(jnp.float32)
    if Np != N:
        b2 = jnp.pad(b2, ((0, 0), (0, Np - N)))

    out = pl.pallas_call(
        partial(_matmul_bias_kernel, activation=activation),
        out_shape=jax.ShapeDtypeStruct((Mp, Np), jnp.float32),
        grid=(Mp // tm, Np // tn, Kp // tk),
        in_specs=[
            pl.BlockSpec((tm, tk), lambda i, j, k: (i, k)),
            pl.BlockSpec((tk, tn), lambda i, j, k: (k, j)),
            pl.BlockSpec((1, tn), lambda i, j, k: (0, j)),
        ],
        out_specs=pl.BlockSpec((tm, tn), lambda i, j, k: (i, j)),
        scratch_shapes=[pltpu.VMEM((tm, tn), jnp.float32)],
        compiler_params=pltpu.CompilerParams(
            dimension_semantics=("parallel", "parallel", "arbitrary")),
    )(xb, wb, b2)

    if (Mp, Np) != (M, N):
        out = out[:M, :N]
    return out


# -----------------------------------------------------------------------------
# Kernel 2: fused FFN  relu(x @ W1 + b1) @ W2 + b2  (intermediate stays in VMEM)
# -----------------------------------------------------------------------------

def _ffn_kernel(x_ref, w1_ref, b1_ref, w2_ref, b2_ref, o_ref, acc_ref):
    j = pl.program_id(1)

    @pl.when(j == 0)
    def _():
        acc_ref[...] = jnp.zeros_like(acc_ref)

    h = jnp.dot(x_ref[...], w1_ref[...], preferred_element_type=jnp.float32)
    h = jnp.maximum(h + b1_ref[...], 0.0)
    acc_ref[...] += jnp.dot(h.astype(w2_ref.dtype), w2_ref[...],
                            preferred_element_type=jnp.float32)

    @pl.when(j == pl.num_programs(1) - 1)
    def _():
        o_ref[...] = (acc_ref[...] + b2_ref[...]).astype(o_ref.dtype)


def ffn_fused(x2d, p):
    """x2d: (M, D) f32, p: {'w1': (D,F), 'b1': (F,), 'w2': (F,D), 'b2': (D,)}"""
    M, D = x2d.shape
    F = p["w1"].shape[1]
    tm, Mp = _pick_tile(M, _TM)
    tf, Fp = _pick_tile(F, _TF)

    xb = x2d.astype(jnp.bfloat16)
    if Mp != M:
        xb = jnp.pad(xb, ((0, Mp - M), (0, 0)))
    w1 = p["w1"].astype(jnp.bfloat16)
    b1 = p["b1"].reshape(1, F).astype(jnp.float32)
    w2 = p["w2"].astype(jnp.bfloat16)
    b2 = p["b2"].reshape(1, D).astype(jnp.float32)
    if Fp != F:
        w1 = jnp.pad(w1, ((0, 0), (0, Fp - F)))
        b1 = jnp.pad(b1, ((0, 0), (0, Fp - F)))
        w2 = jnp.pad(w2, ((0, Fp - F), (0, 0)))

    out = pl.pallas_call(
        _ffn_kernel,
        out_shape=jax.ShapeDtypeStruct((Mp, D), jnp.float32),
        grid=(Mp // tm, Fp // tf),
        in_specs=[
            pl.BlockSpec((tm, D), lambda i, j: (i, 0)),
            pl.BlockSpec((D, tf), lambda i, j: (0, j)),
            pl.BlockSpec((1, tf), lambda i, j: (0, j)),
            pl.BlockSpec((tf, D), lambda i, j: (j, 0)),
            pl.BlockSpec((1, D), lambda i, j: (0, 0)),
        ],
        out_specs=pl.BlockSpec((tm, D), lambda i, j: (i, 0)),
        scratch_shapes=[pltpu.VMEM((tm, D), jnp.float32)],
        compiler_params=pltpu.CompilerParams(
            dimension_semantics=("parallel", "arbitrary")),
    )(xb, w1, b1, w2, b2)

    if Mp != M:
        out = out[:M]
    return out


# -----------------------------------------------------------------------------
# Kernel 3: fused residual-add + LayerNorm, row-tiled
# -----------------------------------------------------------------------------

def _add_ln_kernel(x_ref, y_ref, g_ref, b_ref, o_ref, *, eps):
    z = x_ref[...].astype(jnp.float32) + y_ref[...].astype(jnp.float32)
    mean = jnp.mean(z, axis=-1, keepdims=True)
    var = jnp.mean(jnp.square(z - mean), axis=-1, keepdims=True)
    n = (z - mean) * jax.lax.rsqrt(var + eps)
    o_ref[...] = (n * g_ref[...] + b_ref[...]).astype(o_ref.dtype)


def add_layernorm(x, y, ln, eps=1e-5):
    """x, y: (B, S, D) -> LayerNorm(x + y)."""
    B, S, D = x.shape
    M = B * S
    x2 = x.reshape(M, D)
    y2 = y.reshape(M, D)
    tm, Mp = _pick_tile(M, _TLN)
    if Mp != M:
        x2 = jnp.pad(x2, ((0, Mp - M), (0, 0)))
        y2 = jnp.pad(y2, ((0, Mp - M), (0, 0)))
    g2 = ln["g"].reshape(1, D)
    b2 = ln["b"].reshape(1, D)

    out = pl.pallas_call(
        partial(_add_ln_kernel, eps=eps),
        out_shape=jax.ShapeDtypeStruct((Mp, D), jnp.float32),
        grid=(Mp // tm,),
        in_specs=[
            pl.BlockSpec((tm, D), lambda i: (i, 0)),
            pl.BlockSpec((tm, D), lambda i: (i, 0)),
            pl.BlockSpec((1, D), lambda i: (0, 0)),
            pl.BlockSpec((1, D), lambda i: (0, 0)),
        ],
        out_specs=pl.BlockSpec((tm, D), lambda i: (i, 0)),
        compiler_params=pltpu.CompilerParams(dimension_semantics=("parallel",)),
    )(x2, y2, g2, b2)

    if Mp != M:
        out = out[:M]
    return out.reshape(B, S, D)


# -----------------------------------------------------------------------------
# Kernel 4: fused attention (all heads of one batch element per grid step)
# -----------------------------------------------------------------------------

def _attention_kernel(*refs, scale, has_mask):
    if has_mask:
        q_ref, k_ref, v_ref, m_ref, o_ref = refs
    else:
        q_ref, k_ref, v_ref, o_ref = refs

    q = q_ref[0]   # (H, Sq, Dh) bf16
    k = k_ref[0]   # (H, Sk, Dh) bf16
    v = v_ref[0]   # (H, Sk, Dh) bf16

    s = jnp.einsum("hqd,hkd->hqk", q, k,
                   preferred_element_type=jnp.float32) * scale
    if has_mask:
        s = s + m_ref[0]                       # (Sq, Sk) additive, broadcast over H

    s_max = jnp.max(s, axis=-1, keepdims=True)
    p = jnp.exp(s - s_max)
    denom = jnp.sum(p, axis=-1, keepdims=True)
    p = p * pl.reciprocal(denom, approx=True)  # EUP slot, ~free

    o = jnp.einsum("hqk,hkd->hqd", p.astype(v.dtype), v,
                   preferred_element_type=jnp.float32)
    o_ref[0] = o.astype(o_ref.dtype)


def scaled_dot_product_attention(q, k, v, mask_add, scale):
    """q: (B, H, Sq, Dh) bf16, k/v: (B, H, Sk, Dh) bf16,
       mask_add: None or (1, Sq, Sk) additive f32 (shared over batch & heads)."""
    B, H, Sq, Dh = q.shape
    Sk = k.shape[2]
    has_mask = mask_add is not None

    in_specs = [
        pl.BlockSpec((1, H, Sq, Dh), lambda b: (b, 0, 0, 0)),
        pl.BlockSpec((1, H, Sk, Dh), lambda b: (b, 0, 0, 0)),
        pl.BlockSpec((1, H, Sk, Dh), lambda b: (b, 0, 0, 0)),
    ]
    args = [q, k, v]
    if has_mask:
        in_specs.append(pl.BlockSpec((1, Sq, Sk), lambda b: (0, 0, 0)))
        args.append(mask_add)

    return pl.pallas_call(
        partial(_attention_kernel, scale=scale, has_mask=has_mask),
        out_shape=jax.ShapeDtypeStruct((B, H, Sq, Dh), jnp.float32),
        grid=(B,),
        in_specs=in_specs,
        out_specs=pl.BlockSpec((1, H, Sq, Dh), lambda b: (b, 0, 0, 0)),
        compiler_params=pltpu.CompilerParams(dimension_semantics=("parallel",)),
    )(*args)


# -----------------------------------------------------------------------------
# Model glue (plain JAX): parameter init, embeddings, layer wiring
# -----------------------------------------------------------------------------

def _mha_init(key, d_model):
    k1, k2 = jax.random.split(key)
    return {
        "wqkv": jax.random.normal(k1, (d_model, 3 * d_model), jnp.float32) * 0.02,
        "bqkv": jnp.zeros((3 * d_model,), jnp.float32),
        "wo": jax.random.normal(k2, (d_model, d_model), jnp.float32) * 0.02,
        "bo": jnp.zeros((d_model,), jnp.float32),
    }


def _ffn_init(key, d_model, d_ff):
    k1, k2 = jax.random.split(key)
    return {
        "w1": jax.random.normal(k1, (d_model, d_ff), jnp.float32) * 0.02,
        "b1": jnp.zeros((d_ff,), jnp.float32),
        "w2": jax.random.normal(k2, (d_ff, d_model), jnp.float32) * 0.02,
        "b2": jnp.zeros((d_model,), jnp.float32),
    }


def _ln_init(d_model):
    return {"g": jnp.ones((d_model,), jnp.float32), "b": jnp.zeros((d_model,), jnp.float32)}


def _enc_layer_init(key, d_model, d_ff):
    k1, k2 = jax.random.split(key)
    return {"mha": _mha_init(k1, d_model), "ffn": _ffn_init(k2, d_model, d_ff),
            "ln1": _ln_init(d_model), "ln2": _ln_init(d_model)}


def _dec_layer_init(key, d_model, d_ff):
    k1, k2, k3 = jax.random.split(key, 3)
    return {"self_mha": _mha_init(k1, d_model), "cross_mha": _mha_init(k2, d_model),
            "ffn": _ffn_init(k3, d_model, d_ff),
            "ln1": _ln_init(d_model), "ln2": _ln_init(d_model), "ln3": _ln_init(d_model)}


def sinusoidal_pe(max_len, d_model):
    pos = jnp.arange(max_len, dtype=jnp.float32)[:, None]
    i = jnp.arange(0, d_model, 2, dtype=jnp.float32)[None, :]
    angle = pos / jnp.power(10000.0, i / d_model)
    pe = jnp.zeros((max_len, d_model), jnp.float32)
    pe = pe.at[:, 0::2].set(jnp.sin(angle))
    pe = pe.at[:, 1::2].set(jnp.cos(angle))
    return pe


def init_transformer(key, src_voc, tgt_voc, d_model, n_layers, n_heads, d_ff, max_len):
    keys = jax.random.split(key, 2 * n_layers + 3)
    return {
        "src_emb": jax.random.normal(keys[0], (src_voc, d_model), jnp.float32) * 0.02,
        "tgt_emb": jax.random.normal(keys[1], (tgt_voc, d_model), jnp.float32) * 0.02,
        "pe": sinusoidal_pe(max_len, d_model),
        "enc_layers": [_enc_layer_init(keys[2 + i], d_model, d_ff) for i in range(n_layers)],
        "dec_layers": [_dec_layer_init(keys[2 + n_layers + i], d_model, d_ff)
                       for i in range(n_layers)],
        "out_proj": {
            "w": jax.random.normal(keys[2 + 2 * n_layers], (d_model, tgt_voc), jnp.float32) * 0.02,
            "b": jnp.zeros((tgt_voc,), jnp.float32),
        },
        "n_heads": n_heads,
        "d_model": d_model,
    }


def _prepare_mask(mask, Sq, Sk):
    # TODO(synk): assumes mask is broadcastable over batch & heads (e.g. causal);
    # per-batch padding masks would need a (B, Sq, Sk) variant of the attention call.
    if mask is None:
        return None
    m = jnp.asarray(mask, jnp.float32)
    while m.ndim > 2:
        m = m[0]
    return jnp.broadcast_to(m, (Sq, Sk)).reshape(1, Sq, Sk)


def multi_head_attention(x_q, x_kv, p, mask, n_heads):
    B, Sq, D = x_q.shape
    Sk = x_kv.shape[1]
    Dh = D // n_heads

    if x_q is x_kv:
        # fused Q/K/V projection: one pass over the activation
        qkv = matmul_bias(x_q.reshape(B * Sq, D), p["wqkv"], p["bqkv"])
        q2, k2, v2 = qkv[:, :D], qkv[:, D:2 * D], qkv[:, 2 * D:]
    else:
        # cross-attention: Q from x_q, fused K/V from memory
        q2 = matmul_bias(x_q.reshape(B * Sq, D), p["wqkv"][:, :D], p["bqkv"][:D])
        kv = matmul_bias(x_kv.reshape(B * Sk, D), p["wqkv"][:, D:], p["bqkv"][D:])
        k2, v2 = kv[:, :D], kv[:, D:]

    # TODO(synk): head split/merge transposes kept in XLA (head-major projection
    # output layout would remove these copies).
    q4 = q2.reshape(B, Sq, n_heads, Dh).transpose(0, 2, 1, 3).astype(jnp.bfloat16)
    k4 = k2.reshape(B, Sk, n_heads, Dh).transpose(0, 2, 1, 3).astype(jnp.bfloat16)
    v4 = v2.reshape(B, Sk, n_heads, Dh).transpose(0, 2, 1, 3).astype(jnp.bfloat16)

    mask_add = _prepare_mask(mask, Sq, Sk)
    attn = scaled_dot_product_attention(q4, k4, v4, mask_add, scale=1.0 / math.sqrt(Dh))

    out = attn.transpose(0, 2, 1, 3).reshape(B * Sq, D)
    out = matmul_bias(out, p["wo"], p["bo"])
    return out.reshape(B, Sq, D)


def feed_forward(x, p):
    B, S, D = x.shape
    return ffn_fused(x.reshape(B * S, D), p).reshape(B, S, D)


def encoder_layer(x, p, src_mask, n_heads):
    x = add_layernorm(x, multi_head_attention(x, x, p["mha"], src_mask, n_heads), p["ln1"])
    x = add_layernorm(x, feed_forward(x, p["ffn"]), p["ln2"])
    return x


def decoder_layer(x, memory, p, tgt_mask, memory_mask, n_heads):
    x = add_layernorm(x, multi_head_attention(x, x, p["self_mha"], tgt_mask, n_heads), p["ln1"])
    x = add_layernorm(x, multi_head_attention(x, memory, p["cross_mha"], memory_mask, n_heads),
                      p["ln2"])
    x = add_layernorm(x, feed_forward(x, p["ffn"]), p["ln3"])
    return x


def transformer_forward(params, src_seq, tgt_seq, src_mask=None, tgt_mask=None, memory_mask=None):
    n_heads = params["n_heads"]
    d_model = params["d_model"]
    scale = math.sqrt(d_model)

    # TODO(synk): dropout(p=0.1) is identity here (eval-mode forward).
    # TODO(synk): embedding gather + PE add kept in XLA (tiny vs. matmul/attention cost).
    Ss = src_seq.shape[1]
    St = tgt_seq.shape[1]

    enc = jnp.take(params["src_emb"], src_seq, axis=0) * scale + params["pe"][None, :Ss, :]
    for lp in params["enc_layers"]:
        enc = encoder_layer(enc, lp, src_mask, n_heads)

    dec = jnp.take(params["tgt_emb"], tgt_seq, axis=0) * scale + params["pe"][None, :St, :]
    for lp in params["dec_layers"]:
        dec = decoder_layer(dec, enc, lp, tgt_mask, memory_mask, n_heads)

    B = dec.shape[0]
    logits = matmul_bias(dec.reshape(B * St, d_model),
                         params["out_proj"]["w"], params["out_proj"]["b"])
    return logits.reshape(B, St, -1)


# -----------------------------------------------------------------------------
# Demo
# -----------------------------------------------------------------------------

if __name__ == "__main__":
    # Small shapes consistent with the module (scaled-down hyperparameters).
    SRC_VOC, TGT_VOC = 50, 60
    D_MODEL, N_LAYERS, N_HEADS, D_FF, MAX_LEN = 32, 2, 4, 64, 16
    B, S_SRC, S_TGT = 2, 8, 8

    key = jax.random.PRNGKey(0)
    k_param, k_src, k_tgt = jax.random.split(key, 3)

    params = init_transformer(k_param, SRC_VOC, TGT_VOC, D_MODEL, N_LAYERS, N_HEADS, D_FF, MAX_LEN)

    src_seq = jax.random.randint(k_src, (B, S_SRC), 0, SRC_VOC, dtype=jnp.int32)
    tgt_seq = jax.random.randint(k_tgt, (B, S_TGT), 0, TGT_VOC, dtype=jnp.int32)

    # Causal additive mask for decoder self-attention (0 = keep, -1e9 = masked).
    causal = jnp.where(
        jnp.tril(jnp.ones((S_TGT, S_TGT), jnp.float32)) > 0, 0.0, -1e9
    )[None, None, :, :]  # (1, 1, St, St), broadcastable to (B, H, St, St)

    out = transformer_forward(params, src_seq, tgt_seq,
                              src_mask=None, tgt_mask=causal, memory_mask=None)
    out = jax.block_until_ready(out)

    assert out.shape == (B, S_TGT, TGT_VOC), out.shape
    assert bool(jnp.all(jnp.isfinite(out)))
    print("KERNEL_OK")
</pallas_src>

<mosaic_0001>
module attributes {stable_mosaic.version = 11 : i64} {
  func.func @_matmul_bias_kernel(%arg0: i32, %arg1: i32, %arg2: i32, %arg3: memref<16x32xbf16, #tpu.memory_space<vmem>>, %arg4: memref<32x96xbf16, #tpu.memory_space<vmem>>, %arg5: memref<1x96xf32, #tpu.memory_space<vmem>>, %arg6: memref<16x96xf32, #tpu.memory_space<vmem>>, %arg7: memref<16x96xf32, #tpu.memory_space<vmem>>) attributes {dimension_semantics = [#tpu.dimension_semantics<parallel>, #tpu.dimension_semantics<parallel>, #tpu.dimension_semantics<arbitrary>], iteration_bounds = array<i64: 1, 1, 1>, scalar_prefetch = 0 : i64, scratch_operands = 1 : i64, tpu.core_type = #tpu.core_type<tc>, window_params = [{transform_indices = @transform_0, window_bounds = array<i64: 16, 32>}, {transform_indices = @transform_1, window_bounds = array<i64: 32, 96>}, {transform_indices = @transform_2, window_bounds = array<i64: 1, 96>}, {transform_indices = @transform_3, window_bounds = array<i64: 16, 96>}]} {
    %c0_i32 = arith.constant 0 : i32
    %0 = arith.cmpi eq, %arg2, %c0_i32 : i32
    %1 = arith.extui %0 : i1 to i32
    %c0_i32_0 = arith.constant 0 : i32
    %2 = arith.cmpi ne, %1, %c0_i32_0 : i32
    scf.if %2 {
      %cst_10 = arith.constant 0.000000e+00 : f32
      %12 = vector.broadcast %cst_10 : f32 to vector<16x96xf32>
      %c0_11 = arith.constant 0 : index
      %c0_12 = arith.constant 0 : index
      %13 = vector.load %arg7[%c0_11, %c0_12] : memref<16x96xf32, #tpu.memory_space<vmem>>, vector<16x96xf32>
      tpu.vector_store %arg7[%c0_11, %c0_12], %12 {strides = array<i32>} : memref<16x96xf32, #tpu.memory_space<vmem>>, vector<16x96xf32>,
    } else {
    }
    %c0 = arith.constant 0 : index
    %c0_1 = arith.constant 0 : index
    %3 = vector.load %arg7[%c0, %c0_1] : memref<16x96xf32, #tpu.memory_space<vmem>>, vector<16x96xf32>
    %c0_2 = arith.constant 0 : index
    %c0_3 = arith.constant 0 : index
    %4 = vector.load %arg3[%c0_2, %c0_3] : memref<16x32xbf16, #tpu.memory_space<vmem>>, vector<16x32xbf16>
    %c0_4 = arith.constant 0 : index
    %c0_5 = arith.constant 0 : index
    %5 = vector.load %arg4[%c0_4, %c0_5] : memref<32x96xbf16, #tpu.memory_space<vmem>>, vector<32x96xbf16>
    %cst = arith.constant dense<0.000000e+00> : vector<16x96xf32>
    %6 = tpu.matmul %4, %5, %cst {dimension_numbers = #tpu.dot_dimension_numbers<[1], [0], [0], [1], [0, 0, 1, 1], [], []>} : vector<16x32xbf16>, vector<32x96xbf16>, vector<16x96xf32> -> vector<16x96xf32>
    %7 = arith.addf %3, %6 : vector<16x96xf32>
    %c0_6 = arith.constant 0 : index
    %c0_7 = arith.constant 0 : index
    %8 = vector.load %arg7[%c0_6, %c0_7] : memref<16x96xf32, #tpu.memory_space<vmem>>, vector<16x96xf32>
    tpu.vector_store %arg7[%c0_6, %c0_7], %7 {strides = array<i32>} : memref<16x96xf32, #tpu.memory_space<vmem>>, vector<16x96xf32>,
    %c0_i32_8 = arith.constant 0 : i32
    %9 = arith.cmpi eq, %arg2, %c0_i32_8 : i32
    %10 = arith.extui %9 : i1 to i32
    %c0_i32_9 = arith.constant 0 : i32
    %11 = arith.cmpi ne, %10, %c0_i32_9 : i32
    scf.if %11 {
      %c0_10 = arith.constant 0 : index
      %c0_11 = arith.constant 0 : index
      %12 = vector.load %arg7[%c0_10, %c0_11] : memref<16x96xf32, #tpu.memory_space<vmem>>, vector<16x96xf32>
      %c0_12 = arith.constant 0 : index
      %c0_13 = arith.constant 0 : index
      %13 = vector.load %arg5[%c0_12, %c0_13] : memref<1x96xf32, #tpu.memory_space<vmem>>, vector<1x96xf32>
      %14 = vector.broadcast %13 : vector<1x96xf32> to vector<16x96xf32>
      %15 = arith.addf %12, %14 : vector<16x96xf32>
      %c0_14 = arith.constant 0 : index
      %c0_15 = arith.constant 0 : index
      %16 = vector.load %arg6[%c0_14, %c0_15] : memref<16x96xf32, #tpu.memory_space<vmem>>, vector<16x96xf32>
      tpu.vector_store %arg6[%c0_14, %c0_15], %15 {strides = array<i32>} : memref<16x96xf32, #tpu.memory_space<vmem>>, vector<16x96xf32>,
    } else {
    }
    return
  }
  func.func @transform_0(%arg0: i32, %arg1: i32, %arg2: i32) -> (i32, i32) {
    %c0_i32 = arith.constant 0 : i32
    return %arg0, %arg2 : i32, i32
  }
  func.func @transform_1(%arg0: i32, %arg1: i32, %arg2: i32) -> (i32, i32) {
    %c0_i32 = arith.constant 0 : i32
    return %arg2, %arg1 : i32, i32
  }
  func.func @transform_2(%arg0: i32, %arg1: i32, %arg2: i32) -> (i32, i32) {
    %c0_i32 = arith.constant 0 : i32
    %c0_i32_0 = arith.constant 0 : i32
    return %c0_i32, %arg1 : i32, i32
  }
  func.func @transform_3(%arg0: i32, %arg1: i32, %arg2: i32) -> (i32, i32) {
    %c0_i32 = arith.constant 0 : i32
    return %arg0, %arg1 : i32, i32
  }
}

</mosaic_0001>

<bundles_post_ra>
// kernel: tpu_custom_call.1
= control target key start
LH: loop header
LB: loop body
LE: loop exit
PB: predicated region body
PF: predicated region fallthrough
CT: control target
= control target key end

     0   :  { %8 = vsyncpa [#allocation4], 0  ;;  %s285_s0 = inlined_call_operand.hbm [shape: bf16[16,32], index: 0, kind: input, shape index: {}]   ;;  %s286_s1 = inlined_call_operand.hbm [shape: bf16[32,96], index: 1, kind: input, shape index: {}]   ;;  %s287_s2 = inlined_call_operand.vmem [shape: f32[1,96], index: 2, kind: input, shape index: {}]   ;;  %s288_s3 = inlined_call_operand.hbm [shape: f32[16,96], index: 3, kind: output, shape index: {}]  }
   0x1   :  { %9 = vsyncpa [#allocation7], 0 }
   0x2   :  { %10 = vsyncpa [#allocation5], 0  ;;  %s15_s14 = sshll.u32 %s285_s0, 4  ;;  %s239_s15 = smov [#allocation3]   ;;  %s16_s14 = int_to_ptr.hbm [resolvable:$true] %s15_s14 }
   0x3   :  { %s17_s16 = sshll.u32 %s239_s15, 4  ;;  %s28_s19 = sshll.u32 %s286_s1, 4  ;;  %s18_s16 = int_to_ptr.vmem [resolvable:$true] %s17_s16  ;;  %s29_s19 = int_to_ptr.hbm [resolvable:$true] %s28_s19 }
   0x4   :  { %s240_s20 = smov 64   ;;  %s241_s21 = smov 4  }
   0x5   :  { %23 = dma.hbm_to_vmem [thread:$0]  %s16_s14, 128, %s18_s16, [#allocation4], %s240_s20, %s240_s20, %s241_s21  }
   0x6   :  { %s242_s22 = smov [#allocation6]  }
   0x7   :  { %s30_s23 = sshll.u32 %s242_s22, 4  ;;  %s31_s23 = int_to_ptr.vmem [resolvable:$true] %s30_s23 }
   0x8   :  { %36 = dma.hbm_to_vmem [thread:$0]  %s29_s19, 256, %s31_s23, [#allocation7], %s240_s20, %s240_s20, %s241_s21  }
   0x9   :  { %233 = dma.done.wait [#allocation4], 128  }
   0xa   :  { %234 = vsyncadd [#allocation4], 4294967168 }
   0xb   :  { %235 = dma.done.wait [#allocation7], 256  }
   0xc   :  { %236 = vsyncadd [#allocation7], 4294967040  ;;  %vm52_vm0 = vcmask 785408   ;;  %v243_v0 = vmov 0.0   ;;  %v151_v1 = vld [vmem:[#allocation6 + $0x8] sm:$0xff]  ;;  %v150_v2 = vld [vmem:[#allocation6] sm:$0xff] }
   0xd   :  { %53 = vst.msk [vmem:[#allocation2] sm:$0xff] %vm52_vm0, %v243_v0  ;;  %90 = vmatpush.bf16.msra.mxu0 %v151_v1  ;;  %v149_v3 = vld [vmem:[#allocation3] sm:$0xff]  ;;  %vm80_vm1 = vcmask 261120   ;;  %v160_v8 = vld [vmem:[%s287_s2] ss:$0 sm:$0xff]  ;;  %s244_s24 = smov [#allocation8]  }
   0xe   :  { %54 = vst.msk [vmem:[#allocation2 + $0x8] sm:$0xff] %vm52_vm0, %v243_v0  ;;  %s120_s25 = sshll.u32 %s244_s24, 4  ;;  %s122_s28 = sshll.u32 %s288_s3, 4  ;;  %s121_s25 = int_to_ptr.vmem [resolvable:$true] %s120_s25  ;;  %s123_s28 = int_to_ptr.hbm [resolvable:$true] %s122_s28 }
   0xf   :  { %s245_s2 = smov 128   ;;  %s246_s29 = smov 8  }
  0x11   :  { %91 = vmatpush.bf16.msra.mxu0 %v150_v2 }
  0x14   :  { %148 = vmatmul.msk.bf16.vlgmr.msra.gmra.mxu0 %vm80_vm1, %v149_v3  ;;  %v55_v4 = vld [vmem:[#allocation2] sm:$0xff] }
  0x15   :  { %v56_v7 = vld [vmem:[#allocation2 + $0x8] sm:$0xff] }
  0x91   :  { %v93_v5 = vpop.f32.mrf.mxu0 }
  0x92   :  { %v98_v6 = vadd.f32 %v93_v5, %v55_v4 }
  0x94   :  { %101 = vst.msk [vmem:[#allocation2] sm:$0xff] %vm52_vm0, %v98_v6 }
  0x99   :  { %v95_v9 = vpop.f32.mrf.mxu0 }
  0x9a   :  { %v99_v10 = vadd.f32 %v95_v9, %v56_v7 }
  0x9b   :  { %v106_v11 = vld [vmem:[#allocation2] sm:$0xff] }
  0x9c   :  { %102 = vst.msk [vmem:[#allocation2 + $0x8] sm:$0xff] %vm52_vm0, %v99_v10  ;;  %v112_v12 = vadd.f32 %v160_v8, %v106_v11 }
  0x9e   :  { %114 = vst.msk [vmem:[#allocation8] sm:$0xff] %vm52_vm0, %v112_v12 }
  0xa3   :  { %v107_v13 = vld [vmem:[#allocation2 + $0x8] sm:$0xff] }
  0xa4   :  { %v113_v14 = vadd.f32 %v160_v8, %v107_v13 }
  0xa6   :  { %115 = vst.msk [vmem:[#allocation8 + $0x8] sm:$0xff] %vm52_vm0, %v113_v14 }
  0xa7   :  { %128 = dma.vmem_to_hbm [thread:$0]  %s121_s25, 256, %s123_s28, [#allocation5], %s245_s2, %s245_s2, %s246_s29  }
  0xa8   :  { %237 = dma.done.wait [#allocation5], 256  }
  0xa9   :  { %238 = vsyncadd [#allocation5], 4294967040 }
  0xaa   :  { %133 = vsyncpa [#allocation4], 1 }
  0xab   :  { %134 = vsyncpa [#allocation7], 1 }
  0xac   :  { %135 = vsyncpa [#allocation5], 1 }

</bundles_post_ra>
